<compile_context>
chip_gen: v7x
topology: tpu7x:2x2x1
jax: 0.10.0
libtpu: 0.0.40
codegen_flags: <defaults>
</compile_context>

<pallas_src>
import numpy as np
import jax
import jax.numpy as jnp
from jax.experimental import pallas as pl
from jax.experimental.pallas import tpu as pltpu


def _round_up(x, m):
    return (x + m - 1) // m * m


# ----------------------------- Pallas kernel -------------------------------

def _fourier_loss_kernel(coef_ref, t_ref, out_ref):
    """coef_ref: (TILE_N, 2*D_PAD)  mask-folded [target | pred] coefficients
       t_ref   : (2*D_PAD, 2*COLS)  block-diagonal fourier->poly transform
       out_ref : (1, 8, COLS)       per-tile partial smooth-L1 column sums
    """
    tile_n = coef_ref.shape[0]
    cols = out_ref.shape[2]

    # Single fused MXU push: [target maps | pred maps], each (x|y|pad) wide.
    maps = jnp.dot(coef_ref[...], t_ref[...],
                   preferred_element_type=jnp.float32)          # (tile_n, 2*cols)

    tgt_maps = maps[:, :cols]                                    # lane-aligned split
    pred_maps = maps[:, cols:]

    # smooth L1 (beta = 1, sum reduction); mask already folded into coeffs.
    d = pred_maps - tgt_maps
    ad = jnp.abs(d)
    sl1 = jnp.where(ad < 1.0, 0.5 * (d * d), ad - 0.5)           # (tile_n, cols)

    # Reduce rows to one lane-dense (8, cols) slab per tile (pure VPU adds on
    # sublane-aligned static slices; no cross-lane reduce, no scalar tail).
    part = sl1[0:8, :]
    for r in range(1, tile_n // 8):
        part = part + sl1[r * 8:(r + 1) * 8, :]
    out_ref[0] = part


def _fourier_loss_partial_sums(coef, t_bd, tile_n, cols):
    n_pad = coef.shape[0]
    num_tiles = n_pad // tile_n
    return pl.pallas_call(
        _fourier_loss_kernel,
        out_shape=jax.ShapeDtypeStruct((num_tiles, 8, cols), jnp.float32),
        grid_spec=pltpu.PrefetchScalarGridSpec(
            num_scalar_prefetch=0,
            grid=(num_tiles,),
            in_specs=[
                pl.BlockSpec((tile_n, coef.shape[1]), lambda i: (i, 0)),
                pl.BlockSpec(t_bd.shape, lambda i: (0, 0)),      # constant, loaded once
            ],
            out_specs=pl.BlockSpec((1, 8, cols), lambda i: (i, 0, 0)),
        ),
        compiler_params=pltpu.CompilerParams(
            dimension_semantics=("parallel",),                   # v7x: 2 TCs split tiles
            vmem_limit_bytes=32 * 1024 * 1024,                   # fits v5e/v6e/v7x
        ),
    )(coef, t_bd)


# ------------------------------- JAX glue -----------------------------------

def _cos_sin(fd, ns):
    """cos/sin of the fourier->poly transform matrix, float32 like PyTorch."""
    k = np.arange(-fd, fd + 1, dtype=np.float32).reshape(-1, 1)
    i = np.arange(0, ns, dtype=np.float32).reshape(1, -1)
    T = np.float32(2.0 * np.pi / ns) * (k @ i)                   # (2fd+1, ns)
    return np.cos(T).astype(np.float32), np.sin(T).astype(np.float32)


def _make_fused_transform(fd, ns, d_pad, cols):
    """Block-diagonal, zero-padded transform: (2*d_pad, 2*cols).

    Left column half  -> target maps  [x | y | 0-pad]
    Right column half -> pred maps    [x | y | 0-pad]
    x = real @ cos - imag @ sin ; y = real @ sin + imag @ cos
    """
    kdim = 2 * fd + 1
    c, s = _cos_sin(fd, ns)
    m = np.zeros((2 * d_pad, 2 * cols), np.float32)
    for blk in range(2):                                        # 0: target, 1: pred
        r0 = blk * d_pad
        c0 = blk * cols
        m[r0:r0 + kdim,             c0:c0 + ns] = c             # x: real * cos
        m[r0 + kdim:r0 + 2 * kdim,  c0:c0 + ns] = -s            # x: -imag * sin
        m[r0:r0 + kdim,             c0 + ns:c0 + 2 * ns] = s    # y: real * sin
        m[r0 + kdim:r0 + 2 * kdim,  c0 + ns:c0 + 2 * ns] = c    # y: imag * cos
    return jnp.asarray(m)


def _gather_feat_nchw(output, ind):
    """NCHW-native CenterNet gather: (B,C,H,W), (B,K) -> (B,K,C).

    Equivalent to _tranpose_and_gather_feat but gathers K columns first and
    only transposes the tiny (B, C, K) result (no full feature-map transpose).
    """
    B, C, H, W = output.shape
    feat = output.reshape(B, C, H * W)
    g = jnp.take_along_axis(feat, ind[:, None, :].astype(jnp.int32), axis=2)  # (B,C,K)
    return jnp.transpose(g, (0, 2, 1))                                        # (B,K,C)


def fourier_loss_weighted(output, mask, ind, target, weighted=None, *,
                          fd, ns, tile_n=512):
    """Mirror of FourierLoss_weighted.forward (the `weighted` arg is unused
    by the original module's forward, kept for signature parity)."""
    del weighted
    B, C, H, W = output.shape
    kdim = 2 * fd + 1
    coeff = 2 * kdim
    assert C == coeff

    pred = _gather_feat_nchw(output, ind)                        # (B, K, C)
    N = B * ind.shape[1]

    m = mask.reshape(N, 1).astype(jnp.float32)
    tgt_m = target.reshape(N, coeff).astype(jnp.float32) * m     # fold mask (linear)
    prd_m = pred.reshape(N, coeff).astype(jnp.float32) * m

    d_pad = _round_up(coeff, 8)                                  # sublane-pad contraction dim
    cols = _round_up(2 * ns, 128)                                # lane-pad x|y map columns
    tile = max(8, min(tile_n, _round_up(N, 8)))
    n_pad = _round_up(N, tile)

    # Single operand: [target coeffs (padded) | pred coeffs (padded)], zero rows pad N.
    coef = jnp.zeros((n_pad, 2 * d_pad), jnp.float32)
    coef = coef.at[:N, :coeff].set(tgt_m).at[:N, d_pad:d_pad + coeff].set(prd_m)

    t_bd = _make_fused_transform(fd, ns, d_pad, cols)            # (2*d_pad, 2*cols)

    partials = _fourier_loss_partial_sums(coef, t_bd, tile, cols)
    total = jnp.sum(partials)                                    # = loss_x + loss_y (sums)

    denom = ns * jnp.sum(m) + 1e-4                               # expanded mask.sum() + eps
    return 0.5 * total / denom


# ---------------------------- pure-JAX reference -----------------------------

def _reference_loss(output, mask, ind, target, fd, ns):
    kdim = 2 * fd + 1
    coeff = 2 * kdim
    P = jax.lax.Precision.HIGHEST
    cos_np, sin_np = _cos_sin(fd, ns)
    cosT, sinT = jnp.asarray(cos_np), jnp.asarray(sin_np)

    pred = _gather_feat_nchw(output, ind).reshape(-1, coeff).astype(jnp.float32)
    tgt = target.reshape(-1, coeff).astype(jnp.float32)

    def f2p(c):
        r, im = c[:, :kdim], c[:, kdim:]
        x = jnp.dot(r, cosT, precision=P) - jnp.dot(im, sinT, precision=P)
        y = jnp.dot(r, sinT, precision=P) + jnp.dot(im, cosT, precision=P)
        return x, y

    ft_x, ft_y = f2p(tgt)
    ft_x_pre, ft_y_pre = f2p(pred)
    m = mask.reshape(-1, 1).astype(jnp.float32)                  # expanded over ns by bcast

    def sl1_sum(p, t):
        d = p - t
        ad = jnp.abs(d)
        return jnp.sum(jnp.where(ad < 1.0, 0.5 * d * d, ad - 0.5))

    loss_x = sl1_sum(ft_x_pre * m, ft_x * m)
    loss_y = sl1_sum(ft_y_pre * m, ft_y * m)
    loss = (loss_x + loss_y) / 2.0
    return loss / (ns * jnp.sum(m) + 1e-4)


# --------------------------------- main --------------------------------------

if __name__ == "__main__":
    fd, ns = 2, 8                       # cfg.train.fd, cfg.train.ns
    B, K = 2, 8
    C = 2 * (2 * fd + 1)                # 10 channels
    H = W = 16

    key = jax.random.PRNGKey(0)
    k1, k2, k3, k4 = jax.random.split(key, 4)

    output = jax.random.normal(k1, (B, C, H, W), dtype=jnp.float32)
    target = jax.random.normal(k2, (B, K, C), dtype=jnp.float32)
    ind = jax.random.randint(k3, (B, K), 0, H * W, dtype=jnp.int32)
    mask = (jax.random.uniform(k4, (B, K)) > 0.3).astype(jnp.float32)
    weighted = jnp.ones((B, K), jnp.float32)    # unused by the module's forward

    loss = fourier_loss_weighted(output, mask, ind, target, weighted, fd=fd, ns=ns)
    loss = jax.block_until_ready(loss)

    ref = jax.block_until_ready(_reference_loss(output, mask, ind, target, fd, ns))
    assert np.allclose(np.asarray(loss), np.asarray(ref), rtol=1e-3, atol=1e-4), (loss, ref)

    print("KERNEL_OK")
</pallas_src>

<mosaic_0001>
module attributes {stable_mosaic.version = 11 : i64} {
  func.func @_fourier_loss_kernel(%arg0: i32, %arg1: memref<16x32xf32, #tpu.memory_space<vmem>>, %arg2: memref<32x256xf32, #tpu.memory_space<vmem>>, %arg3: memref<1x8x128xf32, #tpu.memory_space<vmem>>) attributes {dimension_semantics = [#tpu.dimension_semantics<parallel>], iteration_bounds = array<i64: 1>, scalar_prefetch = 0 : i64, scratch_operands = 0 : i64, tpu.core_type = #tpu.core_type<tc>, window_params = [{transform_indices = @transform_0, window_bounds = array<i64: 16, 32>}, {pipeline_mode = #tpu.pipeline_mode<synchronous>, transform_indices = @transform_1, window_bounds = array<i64: 32, 256>}, {transform_indices = @transform_2, window_bounds = array<i64: 1, 8, 128>}]} {
    %c0 = arith.constant 0 : index
    %c0_0 = arith.constant 0 : index
    %0 = vector.load %arg1[%c0, %c0_0] : memref<16x32xf32, #tpu.memory_space<vmem>>, vector<16x32xf32>
    %c0_1 = arith.constant 0 : index
    %c0_2 = arith.constant 0 : index
    %1 = vector.load %arg2[%c0_1, %c0_2] : memref<32x256xf32, #tpu.memory_space<vmem>>, vector<32x256xf32>
    %cst = arith.constant dense<0.000000e+00> : vector<16x256xf32>
    %2 = tpu.matmul %0, %1, %cst {dimension_numbers = #tpu.dot_dimension_numbers<[1], [0], [0], [1], [0, 0, 1, 1], [], []>} : vector<16x32xf32>, vector<32x256xf32>, vector<16x256xf32> -> vector<16x256xf32>
    %3 = vector.extract_strided_slice %2 {offsets = [0, 0], sizes = [16, 128], strides = [1, 1]} : vector<16x256xf32> to vector<16x128xf32>
    %4 = vector.extract_strided_slice %2 {offsets = [0, 128], sizes = [16, 128], strides = [1, 1]} : vector<16x256xf32> to vector<16x128xf32>
    %5 = arith.subf %4, %3 : vector<16x128xf32>
    %6 = math.absf %5 : vector<16x128xf32>
    %cst_3 = arith.constant 1.000000e+00 : f32
    %7 = vector.broadcast %cst_3 : f32 to vector<16x128xf32>
    %8 = arith.cmpf olt, %6, %7 : vector<16x128xf32>
    %9 = arith.mulf %5, %5 : vector<16x128xf32>
    %cst_4 = arith.constant 5.000000e-01 : f32
    %10 = vector.broadcast %cst_4 : f32 to vector<16x128xf32>
    %11 = arith.mulf %10, %9 : vector<16x128xf32>
    %cst_5 = arith.constant 5.000000e-01 : f32
    %12 = vector.broadcast %cst_5 : f32 to vector<16x128xf32>
    %13 = arith.subf %6, %12 : vector<16x128xf32>
    %14 = arith.select %8, %11, %13 : vector<16x128xi1>, vector<16x128xf32>
    %15 = vector.extract_strided_slice %14 {offsets = [0, 0], sizes = [8, 128], strides = [1, 1]} : vector<16x128xf32> to vector<8x128xf32>
    %16 = vector.extract_strided_slice %14 {offsets = [8, 0], sizes = [8, 128], strides = [1, 1]} : vector<16x128xf32> to vector<8x128xf32>
    %17 = arith.addf %15, %16 : vector<8x128xf32>
    %c0_6 = arith.constant 0 : index
    %c0_7 = arith.constant 0 : index
    %c0_8 = arith.constant 0 : index
    %18 = vector.load %arg3[%c0_6, %c0_7, %c0_8] : memref<1x8x128xf32, #tpu.memory_space<vmem>>, vector<1x8x128xf32>
    %19 = vector.shape_cast %18 : vector<1x8x128xf32> to vector<8x128xf32>
    %20 = vector.shape_cast %17 : vector<8x128xf32> to vector<1x8x128xf32>
    tpu.vector_store %arg3[%c0_6, %c0_7, %c0_8], %20 {strides = array<i32>} : memref<1x8x128xf32, #tpu.memory_space<vmem>>, vector<1x8x128xf32>,
    return
  }
  func.func @transform_0(%arg0: i32) -> (i32, i32) {
    %c0_i32 = arith.constant 0 : i32
    %c0_i32_0 = arith.constant 0 : i32
    return %arg0, %c0_i32 : i32, i32
  }
  func.func @transform_1(%arg0: i32) -> (i32, i32) {
    %c0_i32 = arith.constant 0 : i32
    %c0_i32_0 = arith.constant 0 : i32
    %c0_i32_1 = arith.constant 0 : i32
    return %c0_i32, %c0_i32_0 : i32, i32
  }
  func.func @transform_2(%arg0: i32) -> (i32, i32, i32) {
    %c0_i32 = arith.constant 0 : i32
    %c0_i32_0 = arith.constant 0 : i32
    %c0_i32_1 = arith.constant 0 : i32
    return %arg0, %c0_i32, %c0_i32_0 : i32, i32, i32
  }
}

</mosaic_0001>

<bundles_post_ra>
// kernel: tpu_custom_call.1
= control target key start
LH: loop header
LB: loop body
LE: loop exit
PB: predicated region body
PF: predicated region fallthrough
CT: control target
= control target key end

     0   :  { %7 = vsyncpa [#allocation3], 0  ;;  %s321_s0 = inlined_call_operand.hbm [shape: f32[16,32], index: 0, kind: input, shape index: {}]   ;;  %s322_s1 = inlined_call_operand.hbm [shape: f32[32,256], index: 1, kind: input, shape index: {}]   ;;  %s323_s2 = inlined_call_operand.hbm [shape: f32[1,8,128], index: 2, kind: output, shape index: {}]  }
   0x1   :  { %8 = vsyncpa [#allocation6], 0 }
   0x2   :  { %9 = vsyncpa [#allocation4], 0  ;;  %s262_s9 = smov [#allocation2]   ;;  %s190_s13 = scalar_lea.hbm %s321_s0, 256 }
   0x3   :  { %s15_s10 = sshll.u32 %s262_s9, 4  ;;  %p191_p0 = scmp.ne.s32.totalorder %s321_s0, %s190_s13  ;;  %s16_s10 = int_to_ptr.vmem [resolvable:$true] %s15_s10 }
   0x4   :  { %p194_p1 = scmp.lt.u32.totalorder %s190_s13, %s321_s0 }
   0x6   :  { %p196_p2 = pnand %p194_p1, %p191_p0 }
   0x8   :  { %199 = shalt.err (!%p196_p2)
}
   0x9   :  { %s200_s18 = scalar_lea.vmem %s16_s10, 256  ;;  %p205_p4 = scmp.lt.s32.totalorder %s16_s10, %s16_s10 }
   0xa   :  { %p201_p3 = scmp.ne.s32.totalorder %s16_s10, %s200_s18  ;;  %p206_p5 = scmp.lt.s32.totalorder %s200_s18, %s200_s18 }
   0xc   :  { %p207_p6 = por %p206_p5, %p205_p4 }
   0xe   :  { %p208_p7 = pnand %p207_p6, %p201_p3 }
  0x10   :  { %211 = shalt.err (!%p208_p7)
}
  0x11   :  { %s263_s19 = smov 128   ;;  %s264_s20 = smov 8  }
  0x12   :  { %21 = dma.hbm_to_vmem [thread:$0]  %s321_s0, 256, %s16_s10, [#allocation3], %s263_s19, %s263_s19, %s264_s20  }
  0x13   :  { %s265_s23 = smov [#allocation5]   ;;  %s212_s27 = scalar_lea.hbm %s322_s1, 1024 }
  0x14   :  { %s27_s24 = sshll.u32 %s265_s23, 4  ;;  %p213_p8 = scmp.ne.s32.totalorder %s322_s1, %s212_s27  ;;  %s28_s24 = int_to_ptr.vmem [resolvable:$true] %s27_s24 }
  0x15   :  { %p216_p9 = scmp.lt.u32.totalorder %s212_s27, %s322_s1 }
  0x17   :  { %p218_p10 = pnand %p216_p9, %p213_p8 }
  0x19   :  { %221 = shalt.err (!%p218_p10)
}
  0x1a   :  { %s222_s4 = scalar_lea.vmem %s28_s24, 1024  ;;  %p227_p12 = scmp.lt.s32.totalorder %s28_s24, %s28_s24 }
  0x1b   :  { %p223_p11 = scmp.ne.s32.totalorder %s28_s24, %s222_s4  ;;  %p228_p13 = scmp.lt.s32.totalorder %s222_s4, %s222_s4 }
  0x1d   :  { %p229_p0 = por %p228_p13, %p227_p12 }
  0x1f   :  { %p230_p1 = pnand %p229_p0, %p223_p11 }
  0x21   :  { %233 = shalt.err (!%p230_p1)
}
  0x22   :  { %s266_s0 = smov 256   ;;  %s267_s5 = smov 16  }
  0x23   :  { %33 = dma.hbm_to_vmem [thread:$0]  %s322_s1, 1024, %s28_s24, [#allocation6], %s266_s0, %s266_s0, %s267_s5  }
  0x24   :  { %256 = dma.done.wait [#allocation3], 256  }
  0x25   :  { %257 = vsyncadd [#allocation3], 4294967040 }
  0x26   :  { %258 = dma.done.wait [#allocation6], 1024  }
  0x27   :  { %259 = vsyncadd [#allocation6], 4294966272  ;;  %v268_v0 = vmov 0.0   ;;  %v43_v1 = vld [vmem:[#allocation5 + $0x8] sm:$0xff]  ;;  %v45_v2 = vld [vmem:[#allocation5 + $0x18] sm:$0xff]  ;;  %vm50_vm0 = vcmask 261120  }
  0x28   :  { %121 = vmatprep.mubr.f32.mxu0 %v268_v0  ;;  %127 = vmatprep.mubr.f32.mxu1 %v268_v0  ;;  %v42_v3 = vld [vmem:[#allocation5] sm:$0xff]  ;;  %v170_v4 = vpack.c.bf16 %v45_v2, %v43_v1  ;;  %v44_v5 = vld [vmem:[#allocation5 + $0x10] sm:$0xff]  ;;  %v47_v6 = vld [vmem:[#allocation5 + $0x28] sm:$0xff]  ;;  %s269_s1 = smov [#allocation7]  }
  0x29   :  { %v49_v7 = vld [vmem:[#allocation5 + $0x38] sm:$0xff]  ;;  %v172_v8 = vpack.c.bf16 %v44_v5, %v42_v3  ;;  %v46_v10 = vld [vmem:[#allocation5 + $0x20] sm:$0xff]  ;;  %v48_v11 = vld [vmem:[#allocation5 + $0x30] sm:$0xff]  ;;  %s156_s8 = sshll.u32 %s269_s1, 4  ;;  %s157_s8 = int_to_ptr.vmem [resolvable:$true] %s156_s8 }
  0x2a   :  { %v174_v9 = vpack.c.bf16 %v49_v7, %v47_v6  ;;  %171 = vmatprep.subr.bf16.mxu0 %v170_v4  ;;  %178 = vmatprep.subr.bf16.mxu1 %v170_v4  ;;  %v176_v12 = vpack.c.bf16 %v48_v11, %v46_v10  ;;  %v40_v13 = vld [vmem:[#allocation2] sm:$0xff]  ;;  %v41_v14 = vld [vmem:[#allocation2 + $0x8] sm:$0xff]  ;;  %s234_s9 = scalar_lea.vmem %s157_s8, 128  ;;  %p239_p3 = scmp.lt.s32.totalorder %s157_s8, %s157_s8 }
  0x2b   :  { %173 = vmatpush1.bf16.msra.mxu0 %v172_v8  ;;  %180 = vmatpush1.bf16.msra.mxu1 %v172_v8  ;;  %p235_p2 = scmp.ne.s32.totalorder %s157_s8, %s234_s9  ;;  %p240_p4 = scmp.lt.s32.totalorder %s234_s9, %s234_s9 }
  0x2c   :  { %175 = vmatprep.subr.bf16.mxu0 %v174_v9  ;;  %179 = vmatprep.subr.bf16.mxu1 %v174_v9 }
  0x2d   :  { %p241_p5 = por %p240_p4, %p239_p3 }
  0x2f   :  { %177 = vmatpush1.bf16.msra.mxu0 %v176_v12  ;;  %181 = vmatpush1.bf16.msra.mxu1 %v176_v12  ;;  %p242_p6 = pnand %p241_p5, %p235_p2 }
  0x32   :  { %166 = vmatmul.mubr.msk.f32.vlgmr.msra.gmra.mrb[0].mxu0 %vm50_vm0, %v40_v13  ;;  %167 = vmatmul.mubr.msk.f32.vlgmr.msra.gmra.mrb[0].mxu1 %vm50_vm0, %v41_v14 }
 0x105   :  { %v123_v15 = vpop.f32.mrb[0].mxu0  ;;  %v129_v16 = vpop.f32.mrb[0].mxu1 }
 0x106   :  { %v125_v17 = vpop.f32.mrb[1].mxu0  ;;  %v131_v18 = vpop.f32.mrb[1].mxu1 }
 0x107   :  { %v134_v19 = vsub.f32 %v125_v17, %v123_v15  ;;  %v135_v20 = vsub.f32 %v131_v18, %v129_v16 }
 0x109   :  { %v136_v21 = vand.u32 2147483647, %v134_v19  ;;  %v140_v22 = vmul.f32 %v134_v19, %v134_v19  ;;  %v137_v23 = vand.u32 2147483647, %v135_v20  ;;  %v141_v24 = vmul.f32 %v135_v20, %v135_v20 }
 0x10b   :  { %vm138_vm1 = vcmp.lt.f32.partialorder %v136_v21, 1.0  ;;  %v142_v25 = vmul.f32 0.5, %v140_v22  ;;  %v168_v26 = vadd.f32 -0.5, %v136_v21  ;;  %vm139_vm2 = vcmp.lt.f32.partialorder %v137_v23, 1.0 }
 0x10c   :  { %v143_v27 = vmul.f32 0.5, %v141_v24  ;;  %v169_v28 = vadd.f32 -0.5, %v137_v23 }
 0x10d   :  { %v146_v29 = vsel %vm138_vm1, %v142_v25, %v168_v26 }
 0x10e   :  { %v147_v30 = vsel %vm139_vm2, %v143_v27, %v169_v28 }
 0x10f   :  { %v148_v31 = vadd.f32 %v147_v30, %v146_v29 }
 0x111   :  { %149 = vst [vmem:[#allocation7] sm:$0xff] %v148_v31 }
 0x112   :  { %245 = shalt.err (!%p242_p6)
}
 0x113   :  { %s246_s12 = scalar_lea.hbm %s323_s2, 128 }
 0x114   :  { %p247_p7 = scmp.ne.s32.totalorder %s323_s2, %s246_s12  ;;  %p250_p8 = scmp.lt.u32.totalorder %s246_s12, %s323_s2 }
 0x116   :  { %p252_p9 = pnand %p250_p8, %p247_p7 }
 0x118   :  { %255 = shalt.err (!%p252_p9)
}
 0x119   :  { %159 = dma.vmem_to_hbm [thread:$0]  %s157_s8, 128, %s323_s2, [#allocation4]  }
 0x11a   :  { %260 = dma.done.wait [#allocation4], 128  }
 0x11b   :  { %261 = vsyncadd [#allocation4], 4294967168 }
 0x11c   :  { %163 = vsyncpa [#allocation3], 1 }
 0x11d   :  { %164 = vsyncpa [#allocation6], 1 }
 0x11e   :  { %165 = vsyncpa [#allocation4], 1 }

</bundles_post_ra>
